<compile_context>
chip_gen: v7x
topology: tpu7x:2x2x1
jax: 0.10.0
libtpu: 0.0.40
codegen_flags: <defaults>
</compile_context>

<pallas_src>
import functools
import math

import numpy as np
import jax
import jax.numpy as jnp
from jax.experimental import pallas as pl
from jax.experimental.pallas import tpu as pltpu

EPS = 1e-5

# small, Llama2-shaped config (all static Python ints)
CFG = dict(
    vocab_size=256,
    emb_dim=64,
    n_heads=4,
    n_layers=2,
    hidden_dim=128,
    context_length=16,
)


# ----------------------------- in-kernel helpers -----------------------------
def _rmsnorm(x, w):
    # x: (T, D) f32, w: (1, D) f32 — x * rsqrt(mean(x^2) + eps) * w
    ms = jnp.mean(x * x, axis=-1, keepdims=True)
    return x * jax.lax.rsqrt(ms + EPS) * w


# ----------------------------- fused Pallas kernel ----------------------------
def _llama_kernel(x_ref, cos_ref, sin_ref, rms1_ref, rms2_ref,
                  wqkv_ref, wo_ref, wgu_ref, w3_ref, rmsf_ref, wout_ref,
                  out_ref, x_scr, *, n_heads, head_dim, emb_dim, hidden_dim):
    l = pl.program_id(1)
    D = emb_dim

    # first layer of this batch block: bring the residual stream into scratch
    @pl.when(l == 0)
    def _():
        x_scr[...] = x_ref[...]

    x = x_scr[...]                                   # (T, D) f32
    T = x.shape[0]

    # causal mask built in-kernel: two iotas + compare (no HBM traffic)
    row = jax.lax.broadcasted_iota(jnp.int32, (T, T), 0)
    col = jax.lax.broadcasted_iota(jnp.int32, (T, T), 1)
    neg_mask = jnp.where(col <= row, 0.0, -1e30).astype(jnp.float32)

    # ---- attention sub-block: x = x + Wo(attn(RMSNorm(x))) ----
    h = _rmsnorm(x, rms1_ref[0]).astype(jnp.bfloat16)
    # one fused lane-dense matmul: columns = [q*scale, (q*scale)@R, k, k@R, v]
    qkv = jnp.dot(h, wqkv_ref[0], preferred_element_type=jnp.float32)  # (T, 5D)
    q, q_rot = qkv[:, 0:D], qkv[:, D:2 * D]
    k, k_rot = qkv[:, 2 * D:3 * D], qkv[:, 3 * D:4 * D]
    v = qkv[:, 4 * D:5 * D]

    # RoPE: rotation baked into the *_rot weight columns -> pure elementwise FMA
    cos = cos_ref[...]                               # (T, D)
    sin = sin_ref[...]
    q = q * cos + q_rot * sin
    k = k * cos + k_rot * sin

    def heads(t):                                    # (T, D) -> (H, T, dh)
        return jnp.stack(
            [t[:, i * head_dim:(i + 1) * head_dim] for i in range(n_heads)],
            axis=0)

    qh = heads(q).astype(jnp.bfloat16)
    kh = heads(k).astype(jnp.bfloat16)
    vh = heads(v).astype(jnp.bfloat16)

    scores = jax.lax.dot_general(                    # (H, T, T), f32
        qh, kh, (((2,), (2,)), ((0,), (0,))),
        preferred_element_type=jnp.float32)
    scores = scores + neg_mask[None]
    m = jnp.max(scores, axis=-1, keepdims=True)
    p = jnp.exp(scores - m)
    denom = jnp.sum(p, axis=-1, keepdims=True)
    # approx reciprocal -> EUP slot; switch to approx=False for exact parity
    p = p * pl.reciprocal(denom, approx=True)

    ctx = jax.lax.dot_general(                       # (H, T, dh)
        p.astype(jnp.bfloat16), vh, (((2,), (1,)), ((0,), (0,))),
        preferred_element_type=jnp.float32)
    ctx_full = jnp.concatenate([ctx[i] for i in range(n_heads)], axis=-1)
    x = x + jnp.dot(ctx_full.astype(jnp.bfloat16), wo_ref[0],
                    preferred_element_type=jnp.float32)

    # ---- feed-forward sub-block: x = x + W3(SiLU(W1 h) * (W2 h)) ----
    h2 = _rmsnorm(x, rms2_ref[0]).astype(jnp.bfloat16)
    gu = jnp.dot(h2, wgu_ref[0], preferred_element_type=jnp.float32)   # (T, 2Hd)
    g, u = gu[:, :hidden_dim], gu[:, hidden_dim:]
    f = (g * jax.nn.sigmoid(g)) * u                  # SiLU(fc1) * fc2, f32
    x = x + jnp.dot(f.astype(jnp.bfloat16), w3_ref[0],
                    preferred_element_type=jnp.float32)
    x_scr[...] = x

    # last layer of this batch block: fused final RMSNorm + LM head
    @pl.when(l == pl.num_programs(1) - 1)
    def _():
        hf = _rmsnorm(x, rmsf_ref[...]).astype(jnp.bfloat16)
        out_ref[...] = jnp.dot(hf, wout_ref[...],
                               preferred_element_type=jnp.float32)


# ----------------------------- wrapper (glue) --------------------------------
def precompute_rope(head_dim, context_length, theta=10000.0):
    inv_freq = 1.0 / (theta ** (np.arange(0, head_dim, 2, dtype=np.float32)
                                / head_dim))
    positions = np.arange(context_length, dtype=np.float32)
    angles = positions[:, None] * inv_freq[None, :]
    angles = np.concatenate([angles, angles], axis=1)     # (ctx, head_dim)
    return np.cos(angles), np.sin(angles)


def _rotation_matrix(emb_dim, n_heads):
    # block-diagonal signed permutation R with per-head blocks implementing
    # rotated = concat([-x2, x1]); folded into Wq/Wk at init time.
    dh = emb_dim // n_heads
    half = dh // 2
    R = np.zeros((emb_dim, emb_dim), np.float32)
    for h in range(n_heads):
        o = h * dh
        for j in range(half):
            R[o + j + half, o + j] = -1.0
            R[o + j, o + j + half] = 1.0
    return R


def init_params(cfg, key):
    D, V = cfg["emb_dim"], cfg["vocab_size"]
    Hd, NH, L = cfg["hidden_dim"], cfg["n_heads"], cfg["n_layers"]
    dh = D // NH
    keys = iter(jax.random.split(key, 2 + 7 * L))

    def w(shape, scale=0.02):
        return scale * jax.random.normal(next(keys), shape, dtype=jnp.float32)

    R = jnp.asarray(_rotation_matrix(D, NH))
    qk_scale = 1.0 / math.sqrt(dh)

    wqkv, wo, wgu, w3 = [], [], [], []
    for _ in range(L):
        wq = w((D, D)) * qk_scale            # fold 1/sqrt(head_dim) into Wq
        wk = w((D, D))
        wv = w((D, D))
        wqkv.append(jnp.concatenate([wq, wq @ R, wk, wk @ R, wv], axis=1))
        wo.append(w((D, D)))
        w1 = w((D, Hd))
        w2 = w((D, Hd))
        wgu.append(jnp.concatenate([w1, w2], axis=1))
        w3.append(w((Hd, D)))

    cos, sin = precompute_rope(dh, cfg["context_length"])
    return dict(
        tok_emb=w((V, D)),
        rms1=jnp.ones((L, 1, D), jnp.float32),
        rms2=jnp.ones((L, 1, D), jnp.float32),
        wqkv=jnp.stack(wqkv).astype(jnp.bfloat16),   # (L, D, 5D)
        wo=jnp.stack(wo).astype(jnp.bfloat16),       # (L, D, D)
        wgu=jnp.stack(wgu).astype(jnp.bfloat16),     # (L, D, 2Hd)
        w3=jnp.stack(w3).astype(jnp.bfloat16),       # (L, Hd, D)
        final_norm=jnp.ones((1, D), jnp.float32),
        out_head=w((D, V)).astype(jnp.bfloat16),
        cos=jnp.asarray(cos), sin=jnp.asarray(sin),  # (ctx, dh)
    )


def llama2_forward(params, in_idx, *, n_heads, n_layers):
    B, T = in_idx.shape
    D = params["tok_emb"].shape[1]
    V = params["out_head"].shape[1]
    Hd = params["w3"].shape[1]
    head_dim = D // n_heads
    M = B * T

    # token-embedding gather stays in plain JAX (data-dependent gather glue)
    x = params["tok_emb"][in_idx].reshape(M, D).astype(jnp.float32)

    # per-head cos/sin tiled to (T, D) so in-kernel RoPE is elementwise
    cos = jnp.tile(params["cos"][:T], (1, n_heads)).astype(jnp.float32)
    sin = jnp.tile(params["sin"][:T], (1, n_heads)).astype(jnp.float32)

    def const_spec(shape):
        nd = len(shape)
        return pl.BlockSpec(shape, lambda b, l, _nd=nd: (0,) * _nd)

    def per_layer_spec(shape):
        nd = len(shape)
        return pl.BlockSpec(shape, lambda b, l, _nd=nd: (l,) + (0,) * (_nd - 1))

    def per_batch_spec(shape):               # row blocks of flattened (M, ...)
        return pl.BlockSpec(shape, lambda b, l: (b, 0))

    kernel = functools.partial(_llama_kernel, n_heads=n_heads,
                               head_dim=head_dim, emb_dim=D, hidden_dim=Hd)

    logits = pl.pallas_call(
        kernel,
        out_shape=jax.ShapeDtypeStruct((M, V), jnp.float32),
        grid=(B, n_layers),
        in_specs=[
            per_batch_spec((T, D)),          # residual init (fetched once per b)
            const_spec((T, D)),              # cos (heads-tiled)
            const_spec((T, D)),              # sin
            per_layer_spec((1, 1, D)),       # rms1
            per_layer_spec((1, 1, D)),       # rms2
            per_layer_spec((1, D, 5 * D)),   # fused [q*s, (q*s)R, k, kR, v]
            per_layer_spec((1, D, D)),       # wo
            per_layer_spec((1, D, 2 * Hd)),  # fused [w1 | w2]
            per_layer_spec((1, Hd, D)),      # w3
            const_spec((1, D)),              # final_norm
            const_spec((D, V)),              # out_head
        ],
        out_specs=per_batch_spec((T, V)),
        scratch_shapes=[pltpu.VMEM((T, D), jnp.float32)],   # residual stream
        compiler_params=pltpu.CompilerParams(
            dimension_semantics=("parallel", "arbitrary"),
            vmem_limit_bytes=32 * 1024 * 1024),
    )(x, cos, sin, params["rms1"], params["rms2"],
      params["wqkv"], params["wo"], params["wgu"], params["w3"],
      params["final_norm"], params["out_head"])

    return logits.reshape(B, T, V)


if __name__ == "__main__":
    key = jax.random.PRNGKey(0)
    k_params, k_idx = jax.random.split(key)

    params = init_params(CFG, k_params)
    B, T = 2, 8
    in_idx = jax.random.randint(k_idx, (B, T), 0, CFG["vocab_size"],
                                dtype=jnp.int32)

    fwd = jax.jit(functools.partial(llama2_forward,
                                    n_heads=CFG["n_heads"],
                                    n_layers=CFG["n_layers"]))
    logits = fwd(params, in_idx)
    jax.block_until_ready(logits)

    assert logits.shape == (B, T, CFG["vocab_size"]), logits.shape
    assert bool(jnp.all(jnp.isfinite(logits)))
    print("KERNEL_OK")
</pallas_src>

<mosaic_0001>
module attributes {stable_mosaic.version = 11 : i64} {
  func.func @_llama_kernel(%arg0: i32, %arg1: i32, %arg2: memref<8x64xf32, #tpu.memory_space<vmem>>, %arg3: memref<8x64xf32, #tpu.memory_space<vmem>>, %arg4: memref<8x64xf32, #tpu.memory_space<vmem>>, %arg5: memref<1x1x64xf32, #tpu.memory_space<vmem>>, %arg6: memref<1x1x64xf32, #tpu.memory_space<vmem>>, %arg7: memref<1x64x320xbf16, #tpu.memory_space<vmem>>, %arg8: memref<1x64x64xbf16, #tpu.memory_space<vmem>>, %arg9: memref<1x64x256xbf16, #tpu.memory_space<vmem>>, %arg10: memref<1x128x64xbf16, #tpu.memory_space<vmem>>, %arg11: memref<1x64xf32, #tpu.memory_space<vmem>>, %arg12: memref<64x256xbf16, #tpu.memory_space<vmem>>, %arg13: memref<8x256xf32, #tpu.memory_space<vmem>>, %arg14: memref<8x64xf32, #tpu.memory_space<vmem>>) attributes {dimension_semantics = [#tpu.dimension_semantics<parallel>, #tpu.dimension_semantics<arbitrary>], iteration_bounds = array<i64: 2, 2>, scalar_prefetch = 0 : i64, scratch_operands = 1 : i64, tpu.core_type = #tpu.core_type<tc>, window_params = [{transform_indices = @transform_0, window_bounds = array<i64: 8, 64>}, {pipeline_mode = #tpu.pipeline_mode<synchronous>, transform_indices = @transform_1, window_bounds = array<i64: 8, 64>}, {pipeline_mode = #tpu.pipeline_mode<synchronous>, transform_indices = @transform_2, window_bounds = array<i64: 8, 64>}, {transform_indices = @transform_3, window_bounds = array<i64: 1, 1, 64>}, {transform_indices = @transform_4, window_bounds = array<i64: 1, 1, 64>}, {transform_indices = @transform_5, window_bounds = array<i64: 1, 64, 320>}, {transform_indices = @transform_6, window_bounds = array<i64: 1, 64, 64>}, {transform_indices = @transform_7, window_bounds = array<i64: 1, 64, 256>}, {transform_indices = @transform_8, window_bounds = array<i64: 1, 128, 64>}, {pipeline_mode = #tpu.pipeline_mode<synchronous>, transform_indices = @transform_9, window_bounds = array<i64: 1, 64>}, {pipeline_mode = #tpu.pipeline_mode<synchronous>, transform_indices = @transform_10, window_bounds = array<i64: 64, 256>}, {transform_indices = @transform_11, window_bounds = array<i64: 8, 256>}]} {
    %c0_i32 = arith.constant 0 : i32
    %0 = arith.cmpi eq, %arg1, %c0_i32 : i32
    %1 = arith.extui %0 : i1 to i32
    %c0_i32_0 = arith.constant 0 : i32
    %2 = arith.cmpi ne, %1, %c0_i32_0 : i32
    scf.if %2 {
      %c0_43 = arith.constant 0 : index
      %c0_44 = arith.constant 0 : index
      %137 = vector.load %arg2[%c0_43, %c0_44] : memref<8x64xf32, #tpu.memory_space<vmem>>, vector<8x64xf32>
      %c0_45 = arith.constant 0 : index
      %c0_46 = arith.constant 0 : index
      %138 = vector.load %arg14[%c0_45, %c0_46] : memref<8x64xf32, #tpu.memory_space<vmem>>, vector<8x64xf32>
      tpu.vector_store %arg14[%c0_45, %c0_46], %137 {strides = array<i32>} : memref<8x64xf32, #tpu.memory_space<vmem>>, vector<8x64xf32>,
    } else {
    }
    %c0 = arith.constant 0 : index
    %c0_1 = arith.constant 0 : index
    %3 = vector.load %arg14[%c0, %c0_1] : memref<8x64xf32, #tpu.memory_space<vmem>>, vector<8x64xf32>
    %4 = tpu.iota {dimensions = array<i32: 0>} : vector<8x8xi32>
    %5 = tpu.iota {dimensions = array<i32: 1>} : vector<8x8xi32>
    %6 = arith.cmpi sle, %5, %4 : vector<8x8xi32>
    %cst = arith.constant 0.000000e+00 : f32
    %cst_2 = arith.constant -1.000000e+30 : f32
    %7 = vector.broadcast %cst : f32 to vector<8x8xf32>
    %8 = vector.broadcast %cst_2 : f32 to vector<8x8xf32>
    %9 = arith.select %6, %7, %8 : vector<8x8xi1>, vector<8x8xf32>
    %c0_3 = arith.constant 0 : index
    %c0_4 = arith.constant 0 : index
    %c0_5 = arith.constant 0 : index
    %10 = vector.load %arg5[%c0_3, %c0_4, %c0_5] : memref<1x1x64xf32, #tpu.memory_space<vmem>>, vector<1x1x64xf32>
    %11 = vector.shape_cast %10 : vector<1x1x64xf32> to vector<1x64xf32>
    %12 = arith.mulf %3, %3 : vector<8x64xf32>
    %cst_6 = arith.constant dense<0.000000e+00> : vector<8xf32>
    %13 = vector.multi_reduction <add>, %12, %cst_6 [1] : vector<8x64xf32> to vector<8xf32>
    %14 = vector.shape_cast %13 : vector<8xf32> to vector<8x1xf32>
    %cst_7 = arith.constant 6.400000e+01 : f32
    %15 = vector.broadcast %cst_7 : f32 to vector<8x1xf32>
    %16 = arith.divf %14, %15 : vector<8x1xf32>
    %cst_8 = arith.constant 9.99999974E-6 : f32
    %17 = vector.broadcast %cst_8 : f32 to vector<8x1xf32>
    %18 = arith.addf %16, %17 : vector<8x1xf32>
    %19 = math.rsqrt %18 : vector<8x1xf32>
    %20 = vector.broadcast %19 : vector<8x1xf32> to vector<8x64xf32>
    %21 = arith.mulf %3, %20 : vector<8x64xf32>
    %22 = vector.broadcast %11 : vector<1x64xf32> to vector<8x64xf32>
    %23 = arith.mulf %21, %22 : vector<8x64xf32>
    %24 = arith.truncf %23 : vector<8x64xf32> to vector<8x64xbf16>
    %c0_9 = arith.constant 0 : index
    %c0_10 = arith.constant 0 : index
    %c0_11 = arith.constant 0 : index
    %25 = vector.load %arg7[%c0_9, %c0_10, %c0_11] : memref<1x64x320xbf16, #tpu.memory_space<vmem>>, vector<1x64x320xbf16>
    %26 = vector.shape_cast %25 : vector<1x64x320xbf16> to vector<64x320xbf16>
    %cst_12 = arith.constant dense<0.000000e+00> : vector<8x320xf32>
    %27 = tpu.matmul %24, %26, %cst_12 {dimension_numbers = #tpu.dot_dimension_numbers<[1], [0], [0], [1], [0, 0, 1, 1], [], []>} : vector<8x64xbf16>, vector<64x320xbf16>, vector<8x320xf32> -> vector<8x320xf32>
    %28 = vector.extract_strided_slice %27 {offsets = [0, 0], sizes = [8, 64], strides = [1, 1]} : vector<8x320xf32> to vector<8x64xf32>
    %29 = vector.extract_strided_slice %27 {offsets = [0, 64], sizes = [8, 64], strides = [1, 1]} : vector<8x320xf32> to vector<8x64xf32>
    %30 = vector.extract_strided_slice %27 {offsets = [0, 128], sizes = [8, 64], strides = [1, 1]} : vector<8x320xf32> to vector<8x64xf32>
    %31 = vector.extract_strided_slice %27 {offsets = [0, 192], sizes = [8, 64], strides = [1, 1]} : vector<8x320xf32> to vector<8x64xf32>
    %32 = vector.extract_strided_slice %27 {offsets = [0, 256], sizes = [8, 64], strides = [1, 1]} : vector<8x320xf32> to vector<8x64xf32>
    %c0_13 = arith.constant 0 : index
    %c0_14 = arith.constant 0 : index
    %33 = vector.load %arg3[%c0_13, %c0_14] : memref<8x64xf32, #tpu.memory_space<vmem>>, vector<8x64xf32>
    %c0_15 = arith.constant 0 : index
    %c0_16 = arith.constant 0 : index
    %34 = vector.load %arg4[%c0_15, %c0_16] : memref<8x64xf32, #tpu.memory_space<vmem>>, vector<8x64xf32>
    %35 = arith.mulf %28, %33 : vector<8x64xf32>
    %36 = arith.mulf %29, %34 : vector<8x64xf32>
    %37 = arith.addf %35, %36 : vector<8x64xf32>
    %38 = arith.mulf %30, %33 : vector<8x64xf32>
    %39 = arith.mulf %31, %34 : vector<8x64xf32>
    %40 = arith.addf %38, %39 : vector<8x64xf32>
    %41 = vector.extract_strided_slice %37 {offsets = [0, 0], sizes = [8, 16], strides = [1, 1]} : vector<8x64xf32> to vector<8x16xf32>
    %42 = vector.extract_strided_slice %37 {offsets = [0, 16], sizes = [8, 16], strides = [1, 1]} : vector<8x64xf32> to vector<8x16xf32>
    %43 = vector.extract_strided_slice %37 {offsets = [0, 32], sizes = [8, 16], strides = [1, 1]} : vector<8x64xf32> to vector<8x16xf32>
    %44 = vector.extract_strided_slice %37 {offsets = [0, 48], sizes = [8, 16], strides = [1, 1]} : vector<8x64xf32> to vector<8x16xf32>
    %45 = vector.shape_cast %41 : vector<8x16xf32> to vector<1x8x16xf32>
    %46 = vector.shape_cast %42 : vector<8x16xf32> to vector<1x8x16xf32>
    %47 = vector.shape_cast %43 : vector<8x16xf32> to vector<1x8x16xf32>
    %48 = vector.shape_cast %44 : vector<8x16xf32> to vector<1x8x16xf32>
    %49 = tpu.concatenate %45, %46, %47, %48 in 0 : vector<1x8x16xf32>, vector<1x8x16xf32>, vector<1x8x16xf32>, vector<1x8x16xf32> -> vector<4x8x16xf32>
    %50 = arith.truncf %49 : vector<4x8x16xf32> to vector<4x8x16xbf16>
    %51 = vector.extract_strided_slice %40 {offsets = [0, 0], sizes = [8, 16], strides = [1, 1]} : vector<8x64xf32> to vector<8x16xf32>
    %52 = vector.extract_strided_slice %40 {offsets = [0, 16], sizes = [8, 16], strides = [1, 1]} : vector<8x64xf32> to vector<8x16xf32>
    %53 = vector.extract_strided_slice %40 {offsets = [0, 32], sizes = [8, 16], strides = [1, 1]} : vector<8x64xf32> to vector<8x16xf32>
    %54 = vector.extract_strided_slice %40 {offsets = [0, 48], sizes = [8, 16], strides = [1, 1]} : vector<8x64xf32> to vector<8x16xf32>
    %55 = vector.shape_cast %51 : vector<8x16xf32> to vector<1x8x16xf32>
    %56 = vector.shape_cast %52 : vector<8x16xf32> to vector<1x8x16xf32>
    %57 = vector.shape_cast %53 : vector<8x16xf32> to vector<1x8x16xf32>
    %58 = vector.shape_cast %54 : vector<8x16xf32> to vector<1x8x16xf32>
    %59 = tpu.concatenate %55, %56, %57, %58 in 0 : vector<1x8x16xf32>, vector<1x8x16xf32>, vector<1x8x16xf32>, vector<1x8x16xf32> -> vector<4x8x16xf32>
    %60 = arith.truncf %59 : vector<4x8x16xf32> to vector<4x8x16xbf16>
    %61 = vector.extract_strided_slice %32 {offsets = [0, 0], sizes = [8, 16], strides = [1, 1]} : vector<8x64xf32> to vector<8x16xf32>
    %62 = vector.extract_strided_slice %32 {offsets = [0, 16], sizes = [8, 16], strides = [1, 1]} : vector<8x64xf32> to vector<8x16xf32>
    %63 = vector.extract_strided_slice %32 {offsets = [0, 32], sizes = [8, 16], strides = [1, 1]} : vector<8x64xf32> to vector<8x16xf32>
    %64 = vector.extract_strided_slice %32 {offsets = [0, 48], sizes = [8, 16], strides = [1, 1]} : vector<8x64xf32> to vector<8x16xf32>
    %65 = vector.shape_cast %61 : vector<8x16xf32> to vector<1x8x16xf32>
    %66 = vector.shape_cast %62 : vector<8x16xf32> to vector<1x8x16xf32>
    %67 = vector.shape_cast %63 : vector<8x16xf32> to vector<1x8x16xf32>
    %68 = vector.shape_cast %64 : vector<8x16xf32> to vector<1x8x16xf32>
    %69 = tpu.concatenate %65, %66, %67, %68 in 0 : vector<1x8x16xf32>, vector<1x8x16xf32>, vector<1x8x16xf32>, vector<1x8x16xf32> -> vector<4x8x16xf32>
    %70 = arith.truncf %69 : vector<4x8x16xf32> to vector<4x8x16xbf16>
    %cst_17 = arith.constant dense<0.000000e+00> : vector<4x8x8xf32>
    %71 = tpu.matmul %50, %60, %cst_17 {dimension_numbers = #tpu.dot_dimension_numbers<[2], [2], [1], [1], [0, 0, 0, 1, 1, 1], [0], [0]>} : vector<4x8x16xbf16>, vector<4x8x16xbf16>, vector<4x8x8xf32> -> vector<4x8x8xf32>
    %72 = vector.shape_cast %9 : vector<8x8xf32> to vector<1x8x8xf32>
    %73 = vector.broadcast %72 : vector<1x8x8xf32> to vector<4x8x8xf32>
    %74 = arith.addf %71, %73 : vector<4x8x8xf32>
    %cst_18 = arith.constant dense<0xFF800000> : vector<4x8xf32>
    %75 = vector.multi_reduction <maximumf>, %74, %cst_18 [2] : vector<4x8x8xf32> to vector<4x8xf32>
    %76 = vector.shape_cast %75 : vector<4x8xf32> to vector<4x8x1xf32>
    %77 = vector.broadcast %76 : vector<4x8x1xf32> to vector<4x8x8xf32>
    %78 = arith.subf %74, %77 : vector<4x8x8xf32>
    %79 = math.exp %78 : vector<4x8x8xf32>
    %cst_19 = arith.constant dense<0.000000e+00> : vector<4x8xf32>
    %80 = vector.multi_reduction <add>, %79, %cst_19 [2] : vector<4x8x8xf32> to vector<4x8xf32>
    %81 = vector.shape_cast %80 : vector<4x8xf32> to vector<4x8x1xf32>
    %82 = tpu.reciprocal %81 {approx = true} : vector<4x8x1xf32> -> vector<4x8x1xf32>
    %83 = vector.broadcast %82 : vector<4x8x1xf32> to vector<4x8x8xf32>
    %84 = arith.mulf %79, %83 : vector<4x8x8xf32>
    %85 = arith.truncf %84 : vector<4x8x8xf32> to vector<4x8x8xbf16>
    %cst_20 = arith.constant dense<0.000000e+00> : vector<4x8x16xf32>
    %86 = tpu.matmul %85, %70, %cst_20 {dimension_numbers = #tpu.dot_dimension_numbers<[2], [1], [1], [2], [0, 0, 0, 1, 1, 2], [0], [0]>} : vector<4x8x8xbf16>, vector<4x8x16xbf16>, vector<4x8x16xf32> -> vector<4x8x16xf32>
    %87 = vector.extract_strided_slice %86 {offsets = [0, 0, 0], sizes = [1, 8, 16], strides = [1, 1, 1]} : vector<4x8x16xf32> to vector<1x8x16xf32>
    %88 = vector.shape_cast %87 : vector<1x8x16xf32> to vector<8x16xf32>
    %89 = vector.extract_strided_slice %86 {offsets = [1, 0, 0], sizes = [1, 8, 16], strides = [1, 1, 1]} : vector<4x8x16xf32> to vector<1x8x16xf32>
    %90 = vector.shape_cast %89 : vector<1x8x16xf32> to vector<8x16xf32>
    %91 = vector.extract_strided_slice %86 {offsets = [2, 0, 0], sizes = [1, 8, 16], strides = [1, 1, 1]} : vector<4x8x16xf32> to vector<1x8x16xf32>
    %92 = vector.shape_cast %91 : vector<1x8x16xf32> to vector<8x16xf32>
    %93 = vector.extract_strided_slice %86 {offsets = [3, 0, 0], sizes = [1, 8, 16], strides = [1, 1, 1]} : vector<4x8x16xf32> to vector<1x8x16xf32>
    %94 = vector.shape_cast %93 : vector<1x8x16xf32> to vector<8x16xf32>
    %95 = tpu.concatenate %88, %90, %92, %94 in 1 : vector<8x16xf32>, vector<8x16xf32>, vector<8x16xf32>, vector<8x16xf32> -> vector<8x64xf32>
    %96 = arith.truncf %95 : vector<8x64xf32> to vector<8x64xbf16>
    %c0_21 = arith.constant 0 : index
    %c0_22 = arith.constant 0 : index
    %c0_23 = arith.constant 0 : index
    %97 = vector.load %arg8[%c0_21, %c0_22, %c0_23] : memref<1x64x64xbf16, #tpu.memory_space<vmem>>, vector<1x64x64xbf16>
    %98 = vector.shape_cast %97 : vector<1x64x64xbf16> to vector<64x64xbf16>
    %cst_24 = arith.constant dense<0.000000e+00> : vector<8x64xf32>
    %99 = tpu.matmul %96, %98, %cst_24 {dimension_numbers = #tpu.dot_dimension_numbers<[1], [0], [0], [1], [0, 0, 1, 1], [], []>} : vector<8x64xbf16>, vector<64x64xbf16>, vector<8x64xf32> -> vector<8x64xf32>
    %100 = arith.addf %3, %99 : vector<8x64xf32>
    %c0_25 = arith.constant 0 : index
    %c0_26 = arith.constant 0 : index
    %c0_27 = arith.constant 0 : index
    %101 = vector.load %arg6[%c0_25, %c0_26, %c0_27] : memref<1x1x64xf32, #tpu.memory_space<vmem>>, vector<1x1x64xf32>
    %102 = vector.shape_cast %101 : vector<1x1x64xf32> to vector<1x64xf32>
    %103 = arith.mulf %100, %100 : vector<8x64xf32>
    %cst_28 = arith.constant dense<0.000000e+00> : vector<8xf32>
    %104 = vector.multi_reduction <add>, %103, %cst_28 [1] : vector<8x64xf32> to vector<8xf32>
    %105 = vector.shape_cast %104 : vector<8xf32> to vector<8x1xf32>
    %cst_29 = arith.constant 6.400000e+01 : f32
    %106 = vector.broadcast %cst_29 : f32 to vector<8x1xf32>
    %107 = arith.divf %105, %106 : vector<8x1xf32>
    %cst_30 = arith.constant 9.99999974E-6 : f32
    %108 = vector.broadcast %cst_30 : f32 to vector<8x1xf32>
    %109 = arith.addf %107, %108 : vector<8x1xf32>
    %110 = math.rsqrt %109 : vector<8x1xf32>
    %111 = vector.broadcast %110 : vector<8x1xf32> to vector<8x64xf32>
    %112 = arith.mulf %100, %111 : vector<8x64xf32>
    %113 = vector.broadcast %102 : vector<1x64xf32> to vector<8x64xf32>
    %114 = arith.mulf %112, %113 : vector<8x64xf32>
    %115 = arith.truncf %114 : vector<8x64xf32> to vector<8x64xbf16>
    %c0_31 = arith.constant 0 : index
    %c0_32 = arith.constant 0 : index
    %c0_33 = arith.constant 0 : index
    %116 = vector.load %arg9[%c0_31, %c0_32, %c0_33] : memref<1x64x256xbf16, #tpu.memory_space<vmem>>, vector<1x64x256xbf16>
    %117 = vector.shape_cast %116 : vector<1x64x256xbf16> to vector<64x256xbf16>
    %cst_34 = arith.constant dense<0.000000e+00> : vector<8x256xf32>
    %118 = tpu.matmul %115, %117, %cst_34 {dimension_numbers = #tpu.dot_dimension_numbers<[1], [0], [0], [1], [0, 0, 1, 1], [], []>} : vector<8x64xbf16>, vector<64x256xbf16>, vector<8x256xf32> -> vector<8x256xf32>
    %119 = vector.extract_strided_slice %118 {offsets = [0, 0], sizes = [8, 128], strides = [1, 1]} : vector<8x256xf32> to vector<8x128xf32>
    %120 = vector.extract_strided_slice %118 {offsets = [0, 128], sizes = [8, 128], strides = [1, 1]} : vector<8x256xf32> to vector<8x128xf32>
    %121 = arith.negf %119 : vector<8x128xf32>
    %122 = math.exp %121 : vector<8x128xf32>
    %cst_35 = arith.constant 1.000000e+00 : f32
    %123 = vector.broadcast %cst_35 : f32 to vector<8x128xf32>
    %124 = arith.addf %123, %122 : vector<8x128xf32>
    %125 = arith.divf %123, %124 : vector<8x128xf32>
    %126 = arith.mulf %119, %125 : vector<8x128xf32>
    %127 = arith.mulf %126, %120 : vector<8x128xf32>
    %128 = arith.truncf %127 : vector<8x128xf32> to vector<8x128xbf16>
    %c0_36 = arith.constant 0 : index
    %c0_37 = arith.constant 0 : index
    %c0_38 = arith.constant 0 : index
    %129 = vector.load %arg10[%c0_36, %c0_37, %c0_38] : memref<1x128x64xbf16, #tpu.memory_space<vmem>>, vector<1x128x64xbf16>
    %130 = vector.shape_cast %129 : vector<1x128x64xbf16> to vector<128x64xbf16>
    %cst_39 = arith.constant dense<0.000000e+00> : vector<8x64xf32>
    %131 = tpu.matmul %128, %130, %cst_39 {dimension_numbers = #tpu.dot_dimension_numbers<[1], [0], [0], [1], [0, 0, 1, 1], [], []>} : vector<8x128xbf16>, vector<128x64xbf16>, vector<8x64xf32> -> vector<8x64xf32>
    %132 = arith.addf %100, %131 : vector<8x64xf32>
    %c0_40 = arith.constant 0 : index
    %c0_41 = arith.constant 0 : index
    %133 = vector.load %arg14[%c0_40, %c0_41] : memref<8x64xf32, #tpu.memory_space<vmem>>, vector<8x64xf32>
    tpu.vector_store %arg14[%c0_40, %c0_41], %132 {strides = array<i32>} : memref<8x64xf32, #tpu.memory_space<vmem>>, vector<8x64xf32>,
    %c1_i32 = arith.constant 1 : i32
    %134 = arith.cmpi eq, %arg1, %c1_i32 : i32
    %135 = arith.extui %134 : i1 to i32
    %c0_i32_42 = arith.constant 0 : i32
    %136 = arith.cmpi ne, %135, %c0_i32_42 : i32
    scf.if %136 {
      %c0_43 = arith.constant 0 : index
      %c0_44 = arith.constant 0 : index
      %137 = vector.load %arg11[%c0_43, %c0_44] : memref<1x64xf32, #tpu.memory_space<vmem>>, vector<1x64xf32>
      %138 = arith.mulf %132, %132 : vector<8x64xf32>
      %cst_45 = arith.constant dense<0.000000e+00> : vector<8xf32>
      %139 = vector.multi_reduction <add>, %138, %cst_45 [1] : vector<8x64xf32> to vector<8xf32>
      %140 = vector.shape_cast %139 : vector<8xf32> to vector<8x1xf32>
      %cst_46 = arith.constant 6.400000e+01 : f32
      %141 = vector.broadcast %cst_46 : f32 to vector<8x1xf32>
      %142 = arith.divf %140, %141 : vector<8x1xf32>
      %cst_47 = arith.constant 9.99999974E-6 : f32
      %143 = vector.broadcast %cst_47 : f32 to vector<8x1xf32>
      %144 = arith.addf %142, %143 : vector<8x1xf32>
      %145 = math.rsqrt %144 : vector<8x1xf32>
      %146 = vector.broadcast %145 : vector<8x1xf32> to vector<8x64xf32>
      %147 = arith.mulf %132, %146 : vector<8x64xf32>
      %148 = vector.broadcast %137 : vector<1x64xf32> to vector<8x64xf32>
      %149 = arith.mulf %147, %148 : vector<8x64xf32>
      %150 = arith.truncf %149 : vector<8x64xf32> to vector<8x64xbf16>
      %c0_48 = arith.constant 0 : index
      %c0_49 = arith.constant 0 : index
      %151 = vector.load %arg12[%c0_48, %c0_49] : memref<64x256xbf16, #tpu.memory_space<vmem>>, vector<64x256xbf16>
      %cst_50 = arith.constant dense<0.000000e+00> : vector<8x256xf32>
      %152 = tpu.matmul %150, %151, %cst_50 {dimension_numbers = #tpu.dot_dimension_numbers<[1], [0], [0], [1], [0, 0, 1, 1], [], []>} : vector<8x64xbf16>, vector<64x256xbf16>, vector<8x256xf32> -> vector<8x256xf32>
      %c0_51 = arith.constant 0 : index
      %c0_52 = arith.constant 0 : index
      %153 = vector.load %arg13[%c0_51, %c0_52] : memref<8x256xf32, #tpu.memory_space<vmem>>, vector<8x256xf32>
      tpu.vector_store %arg13[%c0_51, %c0_52], %152 {strides = array<i32>} : memref<8x256xf32, #tpu.memory_space<vmem>>, vector<8x256xf32>,
    } else {
    }
    return
  }
  func.func @transform_0(%arg0: i32, %arg1: i32) -> (i32, i32) {
    %c0_i32 = arith.constant 0 : i32
    %c0_i32_0 = arith.constant 0 : i32
    return %arg0, %c0_i32 : i32, i32
  }
  func.func @transform_1(%arg0: i32, %arg1: i32) -> (i32, i32) {
    %c0_i32 = arith.constant 0 : i32
    %c0_i32_0 = arith.constant 0 : i32
    %c0_i32_1 = arith.constant 0 : i32
    return %c0_i32, %c0_i32_0 : i32, i32
  }
  func.func @transform_2(%arg0: i32, %arg1: i32) -> (i32, i32) {
    %c0_i32 = arith.constant 0 : i32
    %c0_i32_0 = arith.constant 0 : i32
    %c0_i32_1 = arith.constant 0 : i32
    return %c0_i32, %c0_i32_0 : i32, i32
  }
  func.func @transform_3(%arg0: i32, %arg1: i32) -> (i32, i32, i32) {
    %c0_i32 = arith.constant 0 : i32
    %c0_i32_0 = arith.constant 0 : i32
    %c0_i32_1 = arith.constant 0 : i32
    return %arg1, %c0_i32, %c0_i32_0 : i32, i32, i32
  }
  func.func @transform_4(%arg0: i32, %arg1: i32) -> (i32, i32, i32) {
    %c0_i32 = arith.constant 0 : i32
    %c0_i32_0 = arith.constant 0 : i32
    %c0_i32_1 = arith.constant 0 : i32
    return %arg1, %c0_i32, %c0_i32_0 : i32, i32, i32
  }
  func.func @transform_5(%arg0: i32, %arg1: i32) -> (i32, i32, i32) {
    %c0_i32 = arith.constant 0 : i32
    %c0_i32_0 = arith.constant 0 : i32
    %c0_i32_1 = arith.constant 0 : i32
    return %arg1, %c0_i32, %c0_i32_0 : i32, i32, i32
  }
  func.func @transform_6(%arg0: i32, %arg1: i32) -> (i32, i32, i32) {
    %c0_i32 = arith.constant 0 : i32
    %c0_i32_0 = arith.constant 0 : i32
    %c0_i32_1 = arith.constant 0 : i32
    return %arg1, %c0_i32, %c0_i32_0 : i32, i32, i32
  }
  func.func @transform_7(%arg0: i32, %arg1: i32) -> (i32, i32, i32) {
    %c0_i32 = arith.constant 0 : i32
    %c0_i32_0 = arith.constant 0 : i32
    %c0_i32_1 = arith.constant 0 : i32
    return %arg1, %c0_i32, %c0_i32_0 : i32, i32, i32
  }
  func.func @transform_8(%arg0: i32, %arg1: i32) -> (i32, i32, i32) {
    %c0_i32 = arith.constant 0 : i32
    %c0_i32_0 = arith.constant 0 : i32
    %c0_i32_1 = arith.constant 0 : i32
    return %arg1, %c0_i32, %c0_i32_0 : i32, i32, i32
  }
  func.func @transform_9(%arg0: i32, %arg1: i32) -> (i32, i32) {
    %c0_i32 = arith.constant 0 : i32
    %c0_i32_0 = arith.constant 0 : i32
    %c0_i32_1 = arith.constant 0 : i32
    return %c0_i32, %c0_i32_0 : i32, i32
  }
  func.func @transform_10(%arg0: i32, %arg1: i32) -> (i32, i32) {
    %c0_i32 = arith.constant 0 : i32
    %c0_i32_0 = arith.constant 0 : i32
    %c0_i32_1 = arith.constant 0 : i32
    return %c0_i32, %c0_i32_0 : i32, i32
  }
  func.func @transform_11(%arg0: i32, %arg1: i32) -> (i32, i32) {
    %c0_i32 = arith.constant 0 : i32
    %c0_i32_0 = arith.constant 0 : i32
    return %arg0, %c0_i32 : i32, i32
  }
}

</mosaic_0001>

<bundles_post_ra>
// kernel: tile.14
= control target key start
LH: loop header
LB: loop body
LE: loop exit
PB: predicated region body
PF: predicated region fallthrough
CT: control target
= control target key end

     0   :  { %vm42_vm0 = vcmask 1047556   ;;  %vm44_vm1 = vcmask 130048   ;;  %s93_s22 = smov 16   ;;  %s94_s25 = smov 32   ;;  %vm54_vm2 = vcmask 523648   ;;  %vm64_vm3 = vcmask 392448   ;;  %s146_s0 = inlined_call_operand.vmem [shape: f32[8,4,16], index: 0, kind: input, shape index: {}]   ;;  %s147_s1 = inlined_call_operand.vmem [shape: f32[8,64], index: 1, kind: output, shape index: {}]  }
   0x1   :  { %v82_v0 = vld [vmem:[%s146_s0 + $0x1c] sm:$0xf]  ;;  %v83_v1 = vld [vmem:[%s146_s0 + $0x18] sm:$0xf]  ;;  %v84_v2 = vld [vmem:[%s146_s0 + $0x14] sm:$0xf] }
   0x2   :  { %8 = vst [vmem:[#allocation0 + $0x38] sm:$0xf] %v82_v0  ;;  %13 = vst [vmem:[#allocation0 + $0x30] sm:$0xf] %v83_v1  ;;  %v85_v3 = vld [vmem:[%s146_s0 + $0x10] sm:$0xf] }
   0x3   :  { %18 = vst [vmem:[#allocation0 + $0x28] sm:$0xf] %v84_v2  ;;  %v86_v4 = vld [vmem:[%s146_s0 + $0xc] sm:$0xf]  ;;  %v87_v5 = vld [vmem:[%s146_s0 + $0x8] sm:$0xf] }
   0x4   :  { %23 = vst [vmem:[#allocation0 + $0x20] sm:$0xf] %v85_v3  ;;  %28 = vst [vmem:[#allocation0 + $0x18] sm:$0xf] %v86_v4  ;;  %v88_v6 = vld [vmem:[%s146_s0 + $0x4] sm:$0xf] }
   0x5   :  { %33 = vst [vmem:[#allocation0 + $0x10] sm:$0xf] %v87_v5  ;;  %v38_v7 = vld [vmem:[%s146_s0] sm:$0xf]  ;;  %37 = vst [vmem:[#allocation0 + $0x8] sm:$0xf] %v88_v6 }
   0x6   :  { %39 = vst [vmem:[#allocation0] sm:$0xf] %v38_v7  ;;  %s92_s0 = smov 48   ;;  %vm74_vm4 = vcmask 261248  }
   0xb   :  { %v49_v8 = vld [vmem:[#allocation0 + $0x3] ss:$8 sm:$0xf0]   ;;  %v59_v9 = vld [vmem:[#allocation0 + $0x2] ss:$8 sm:$0xf0]  }
   0xc   :  { %v69_v14 = vld [vmem:[#allocation0 + $0x1] ss:$8 sm:$0xf0]   ;;  %v41_v17 = vld [vmem:[#allocation0] ss:$8 sm:$0xf0]  }
   0xd   :  { %v47_v10 = vld [vmem:[#allocation0 + $0x3] ss:$8 sm:$0xf]   ;;  %v57_v11 = vld [vmem:[#allocation0 + $0x2] ss:$8 sm:$0xf]  }
   0xe   :  { %v51_v12 = vsel %vm42_vm0, %v49_v8, %v47_v10  ;;  %v67_v13 = vld [vmem:[#allocation0 + $0x1] ss:$8 sm:$0xf]   ;;  %v40_v16 = vld [vmem:[#allocation0] ss:$8 sm:$0xf]   ;;  %v61_v18 = vsel %vm42_vm0, %v59_v9, %v57_v11 }
   0xf   :  { %52 = vrot.lane.b32.xlu0 %v51_v12, %s92_s0  ;;  %v71_v15 = vsel %vm42_vm0, %v69_v14, %v67_v13  ;;  %v43_v19 = vsel %vm42_vm0, %v41_v17, %v40_v16 }
  0x10   :  { %72 = vrot.lane.b32.xlu1 %v71_v15, %s93_s22  ;;  %45 = vst.msk [vmem:[%s147_s1] sm:$0xff] %vm44_vm1, %v43_v19  }
  0x13   :  { %62 = vrot.lane.b32.xlu0 %v61_v18, %s94_s25 }
  0x81   :  { %v53_v20 = vpop.permute.xlu0 %52  }
  0x82   :  { %55 = vst.msk [vmem:[%s147_s1] sm:$0xff] %vm54_vm2, %v53_v20   ;;  %v73_v21 = vpop.permute.xlu1 %72  }
  0x85   :  { %v63_v22 = vpop.permute.xlu0 %62  }
  0x86   :  { %65 = vst.msk [vmem:[%s147_s1] sm:$0xff] %vm64_vm3, %v63_v22  }
  0x87   :  { %75 = vst.msk [vmem:[%s147_s1] sm:$0xff] %vm74_vm4, %v73_v21  }

// kernel: llama2_forward.1
= control target key start
LH: loop header
LB: loop body
LE: loop exit
PB: predicated region body
PF: predicated region fallthrough
CT: control target
= control target key end

     0   :  { %s2665_s0 = inlined_call_operand.vmem [shape: f32[16,64], index: 0, kind: input, shape index: {}]   ;;  %s2666_s1 = inlined_call_operand.vmem [shape: f32[8,64], index: 1, kind: input, shape index: {}]   ;;  %s2667_s2 = inlined_call_operand.vmem [shape: f32[8,64], index: 2, kind: input, shape index: {}]   ;;  %s2668_s3 = inlined_call_operand.vmem [shape: f32[2,1,64], index: 3, kind: input, shape index: {}]   ;;  %s2669_s4 = inlined_call_operand.vmem [shape: f32[2,1,64], index: 4, kind: input, shape index: {}]   ;;  %s2670_s5 = inlined_call_operand.vmem [shape: bf16[2,64,320], index: 5, kind: input, shape index: {}]   ;;  %s2671_s6 = inlined_call_operand.vmem [shape: bf16[2,64,64], index: 6, kind: input, shape index: {}]   ;;  %s2672_s7 = inlined_call_operand.vmem [shape: bf16[2,64,256], index: 7, kind: input, shape index: {}]   ;;  %s2673_s8 = inlined_call_operand.vmem [shape: bf16[2,128,64], index: 8, kind: input, shape index: {}]   ;;  %s2674_s9 = inlined_call_operand.vmem [shape: f32[1,64], index: 9, kind: input, shape index: {}]   ;;  %s2675_s10 = inlined_call_operand.vmem [shape: bf16[64,256], index: 10, kind: input, shape index: {}]   ;;  %s2676_s11 = inlined_call_operand.hbm [shape: f32[16,256], index: 11, kind: output, shape index: {}]  }
   0x1   :  { %2691 = sst [smem:[#allocation18_spill]] %s2674_s9 }
   0x2   :  { %2692 = sst [smem:[#allocation19_spill]] %s2676_s11 }
   0x3   :  { %16 = vsyncpa [#allocation4], 0 }
   0x4   :  { %18 = vsyncpa [#allocation4 + $0x1], 0  ;;  %s2305_s17 = smov 0   ;;  %s2307_s18 = smov 0  }
   0x5   :  { %s2309_s19 = smov 0   ;;  %s2311_s20 = smov 0  }
   0x6   :  { %s2313_s21 = smov 0   ;;  %s2315_s22 = smov 0  }
   0x7   :  { %s2317_s23 = smov 0   ;;  %s2319_s24 = smov 0  }
   0x8 LB: > { %2693 = sst [smem:[#allocation6_spill]] %s2202_s17  ;;  %s1765_s25 = sadd.s32 4294967295, %s2230_s24   ;;  %s2230_s24 = sphi %s2319_s24, %s24_s24   ;;  %s2226_s23 = sphi %s2317_s23, %s2724_s23   ;;  %s2222_s22 = sphi %s2315_s22, %s2723_s22   ;;  %s2218_s21 = sphi %s2313_s21, %s2722_s21   ;;  %s2214_s20 = sphi %s2311_s20, %s2721_s20   ;;  %s2210_s19 = sphi %s2309_s19, %s2720_s19   ;;  %s2206_s18 = sphi %s2307_s18, %s2719_s18   ;;  %s2202_s17 = sphi %s2305_s17, %s2718_s17  }
   0x9   : > { %2694 = sst [smem:[#allocation7_spill]] %s2206_s18  ;;  %s1766_s26 = sadd.s32 4294967294, %s2230_s24  }
   0xa   : > { %2695 = sst [smem:[#allocation8_spill]] %s2210_s19  ;;  %s33_s27 = sadd.s32 1, %s2222_s22 }
   0xb   : > { %2696 = sst [smem:[#allocation9_spill]] %s2218_s21  ;;  %p34_p0 = scmp.ge.s32.totalorder %s33_s27, 2 }
   0xc   : > { %2697 = sst [smem:[#allocation10_spill]] %s2222_s22  ;;  %s36_s28 = sadd.s32 1, %s2226_s23 }
   0xd   : > { %2698 = sst [smem:[#allocation11_spill]] %s2226_s23  ;;  %p319_p1 = scmp.ne.s32.totalorder %s2210_s19, %s2206_s18 }
   0xe   : > { %2699 = sst [smem:[#allocation12_spill]] %s2230_s24  ;;  %p320_p2 = scmp.eq.s32.totalorder %s1765_s25, 3 }
   0xf   : > { %s2726_s27 = smov (%p34_p0, %s33_s27), 0  ;;  %s2728_s28 = smov (!%p34_p0, %s36_s28), %s2226_s23 }
  0x10   : > { %2700 = sst [smem:[#allocation13_spill]] %s2726_s27  ;;  %p2354_p3 = por %p320_p2, %p319_p1 }
  0x11   : > { %p325_p4 = scmp.ne.s32.totalorder %s2206_s18, %s2202_s17  ;;  %p38_p5 = scmp.ge.s32.totalorder %s2728_s28, 2 }
  0x12   : > { %s2701_s29 = scalar_select %p2354_p3, 1, 0 }
  0x13   : > { %p326_p6 = scmp.eq.s32.totalorder %s1766_s26, 3  ;;  %p1769_p7 = scmp.ge.s32.totalorder %s2230_s24, 1 }
  0x14   : > { %2702 = sst [smem:[#allocation14_spill]] %s2701_s29  ;;  %p407_p8 = scmp.lt.s32.totalorder %s2230_s24, 5 }
  0x15   : > { %s2730_s28 = smov (%p38_p5, %s2728_s28), 0  ;;  %p2364_p9 = por %p326_p6, %p325_p4 }
  0x16   : > { %2703 = sst [smem:[#allocation15_spill]] %s2730_s28  ;;  %p408_p10 = pnand %p1769_p7, %p407_p8 }
  0x17   : > { %s2704_s30 = scalar_select %p2364_p9, 1, 0 }
  0x18   : > { %s306_s12 = ssub.s32 %s2226_s23, %s2730_s28  ;;  %s309_s13 = sadd.s32 1, %s2210_s19 }
  0x19   : > { %2705 = sst [smem:[#allocation16_spill]] %s2704_s30  ;;  %p307_p11 = scmp.eq.s32.totalorder %s306_s12, 0 }
  0x1a   : > { %411 = sbr.rel (%p408_p10) target bundleno = 2835 (0xb13), region = 64  ;;  %s2681_s15 = sand.u32 (!%p408_p10), 1, %s2206_s18  }
  0x1b   : > { %s2372_s14 = scalar_select %p307_p11, %s2210_s19, %s309_s13  }
  0x1c   : > { %p472_p12 = scmp.lt.s32.totalorder (!%p408_p10), %s2218_s21, 1  ;;  %s1770_s16 = sshll.u32 (!%p408_p10), %s2681_s15, 4 }
  0x1d   : > { %2706 = sst [smem:[#allocation17_spill]] %s2372_s14  ;;  %p476_p13 = scmp.lt.s32.totalorder (!%p408_p10), %s2214_s20, 1 }
  0x1e   : > { %s2417_s30 = scalar_lea.vmem (!%p408_p10), [#allocation3], %s1770_s16  ;;  %p1779_p0 = scmp.ne.s32.totalorder (!%p408_p10), %s2214_s20, 0 }
  0x21   : > { %s473_s25 = scalar_select %p472_p12, %s2218_s21, 1 }
  0x22   : > { %s2381_s26 = scalar_select %p476_p13, %s2214_s20, 1 }
  0x23   : > { %s1771_s12 = sshll.u32 %s473_s25, 3  ;;  %506 = sbr.rel (%p1779_p0) target bundleno = 42 (0x2a), region = 68  ;;  %vm508_vm0 = vcmask (!%p1779_p0), 523264  }
  0x24   : > { %s475_s27 = scalar_lea.vmem %s2665_s0, %s1771_s12  ;;  %s478_s14 = scalar_lea.vmem %s2668_s3, %s2381_s26 }
  0x25   : > { %s1974_s17 = smul.u32 96, %s2381_s26  ;;  %s1843_s24 = sshll.u32 %s2381_s26, 5  ;;  %v507_v0 = vld [vmem:[%s475_s27] sm:$0xff] (!%p1779_p0) }
  0x26   : > { %s1844_s11 = sshll.u32 %s2381_s26, 6  ;;  %s2405_s28 = scalar_lea.vmem %s2671_s6, %s1843_s24  ;;  %509 = vst.msk [vmem:[#allocation2] sm:$0xff] (!%p1779_p0), %vm508_vm0, %v507_v0 }
  0x27   : > { %s2400_s21 = scalar_lea.vmem %s2670_s5, %s1974_s17  ;;  %s2410_s23 = scalar_lea.vmem %s2672_s7, %s1844_s11 }
  0x28   : > { %s2415_s13 = scalar_lea.vmem %s2673_s8, %s1844_s11 }
  0x2a PF: > { %vm519_vm1 = vcmask 523264   ;;  %v2058_v4 = vld [vmem:[%s2400_s21 + $0x4] ss:$12 sps:$4 sm:$0xff]   ;;  %v2060_v5 = vld [vmem:[%s2400_s21] ss:$12 sps:$4 sm:$0xff]   ;;  %v2232_v9 = vmov 0   ;;  %s2707_s15 = scalar_lea.vmem %s2669_s4, %s2381_s26 }
  0x2b   : > { %619 = vmatprep.subr.bf16.mxu1 %v2058_v4  ;;  %v2061_v6 = vld [vmem:[%s2400_s21 + $0x1c] ss:$12 sps:$4 sm:$0xff]   ;;  %v2063_v7 = vld [vmem:[%s2400_s21 + $0x18] ss:$12 sps:$4 sm:$0xff]   ;;  %v2064_v8 = vld [vmem:[%s2400_s21 + $0x34] ss:$12 sps:$4 sm:$0xff]   ;;  %651 = vmatprep.mubr.bf16.mxu1 %v2232_v9 }
  0x2c   : > { %620 = vmatpush1.bf16.msra.mxu1 %v2060_v5  ;;  %v2233_v10 = vmov 0.0   ;;  %v2066_v11 = vld [vmem:[%s2400_s21 + $0x30] ss:$12 sps:$4 sm:$0xff]   ;;  %v2067_v12 = vld [vmem:[%s2400_s21 + $0x4c] ss:$12 sps:$4 sm:$0xff]   ;;  %vm2234_vm2 = vmmov 0  }
  0x2d   : > { %v2420_v1 = vld [vmem:[#allocation2] sm:$0xff]  ;;  %621 = vmatprep.subr.bf16.mxu1 %v2061_v6  ;;  %1894 = vmatprep.subr.bf16.mxu0 %v2233_v10  ;;  %v2069_v13 = vld [vmem:[%s2400_s21 + $0x48] ss:$12 sps:$4 sm:$0xff]   ;;  %s2235_s17 = smov 64   ;;  %v2073_v26 = vld [vmem:[%s2400_s21 + $0x50] ss:$12 sps:$4 sm:$0xff]  }
  0x2e   : > { %v518_v2 = vmul.f32 %v2420_v1, %v2420_v1  ;;  %1896 = vmatprep.mubr.msk.bf16.mxu0 %vm2234_vm2, %v2233_v10  ;;  %v701_v14 = vld [vmem:[%s2667_s2] sm:$0xff]  ;;  %v2070_v22 = vld [vmem:[%s2400_s21 + $0x8] ss:$12 sps:$4 sm:$0xff]   ;;  %vm762_vm3 = vcmask 130048   ;;  %s2236_s29 = smov 80   ;;  %s2238_s16 = smov 96  }
  0x2f   : > { %v1780_v19 = vld [vmem:[%s478_s14] ss:$0 sm:$0xff]  ;;  %v2072_v25 = vld [vmem:[%s2400_s21 + $0x38] ss:$12 sps:$4 sm:$0xff]   ;;  %s2237_s14 = smov 112   ;;  %vm999_vm4 = vcmask 1043456  }
  0x30   : > { %v520_v3 = vsel %vm519_vm1, %v518_v2, 0.0  ;;  %622 = vmatpush1.bf16.msra.mxu1 %v2063_v7  ;;  %v2071_v24 = vld [vmem:[%s2400_s21 + $0x20] ss:$12 sps:$4 sm:$0xff]   ;;  %v511_v2 = vlaneseq  ;;  %v2239_v5 = vmov -1e+30   ;;  %vm947_vm6 = vcmask 64512  }
  0x31   : > { %521 = vadd.xlane.f32.xlu0 %v520_v3  ;;  %623 = vmatprep.subr.bf16.mxu1 %v2064_v8  ;;  %v700_v38 = vld [vmem:[%s2666_s1] sm:$0xff]  ;;  %s2240_s25 = smov 16   ;;  %s2241_s12 = smov 32   ;;  %vm1194_vm7 = vcmask 261120   ;;  %vm1196_vm8 = vcmask 392192  }
  0x32   : > { %v512_v3 = vshrl.u32 %v511_v2, 7  ;;  %v514_v4 = vand.u32 127, %v511_v2  ;;  %s2242_s22 = smov 48   ;;  %p1827_p1 = scmp.ne.s32.totalorder %s2214_s20, 1 }
  0x33   : > { %s2708_s19 = sld [smem:[#allocation18_spill]] (!%p1827_p1) }
  0x34   : > { %624 = vmatpush1.bf16.msra.mxu1 %v2066_v11  ;;  %vm515_vm5 = vcmp.le.s32.totalorder %v514_v4, %v512_v3 }
  0x35   : > { %625 = vmatprep.subr.bf16.mxu1 %v2067_v12  ;;  %v516_v6 = vsel %vm515_vm5, 0.0, %v2239_v5 }
  0x38   : > { %626 = vmatpush1.bf16.msra.mxu1 %v2069_v13 }
  0x39   : > { %1882 = vmatprep.subr.bf16.mxu1 %v2233_v10 }
  0x47   : > { %704 = vrot.lane.b32.xlu0 %v701_v14, %s2235_s17 }
  0xbe   : > { %v522_v15 = vpop.xlane.xlu0 %521 }
  0xbf   : > { %v524_v16 = vmul.f32 0.015625, %v522_v15 }
  0xc1   : > { %v525_v17 = vadd.f32 1e-05, %v524_v16 }
  0xc2   : > { %v705_v27 = vpop.permute.xlu0 %704 }
  0xc3   : > { %2098 = vrsqrt.f32 %v525_v17 }
  0xcd   : > { %v2099_v18 = vpop.eup %2098 }
  0xce   : > { %v527_v20 = vmul.f32 %v2099_v18, %v2420_v1 }
  0xd0   : > { %v534_v21 = vmul.f32 %v1780_v19, %v527_v20 }
  0xd2   : > { %v535_v23 = vpack.c.bf16 %v534_v21, %v534_v21 }
  0xd4   : > { %1793 = vmatmul.mubr.msk.bf16.vlgmr.msra.gmra.mrb[0].mxu1 %vm519_vm1, %v535_v23 }
  0xd5   : > { %1883 = vmatpush3.bf16.msra.mxu1 %v2070_v22  ;;  %1890 = vmatprep.mubr.msk.bf16.mxu1 %vm2234_vm2, %v2233_v10 }
  0xd6   : > { %1884 = vmatprep.subr.bf16.mxu1 %v2233_v10 }
  0xd9   : > { %1885 = vmatpush3.bf16.msra.mxu1 %v2071_v24 }
  0xda   : > { %1886 = vmatprep.subr.bf16.mxu1 %v2233_v10 }
  0xdd   : > { %1887 = vmatpush3.bf16.msra.mxu1 %v2072_v25 }
  0xde   : > { %1888 = vmatprep.subr.bf16.mxu1 %v2233_v10 }
  0xe1   : > { %1889 = vmatpush3.bf16.msra.mxu1 %v2073_v26 }
  0xe2   : > { %1900 = vmatprep.subr.bf16.mxu1 %v2233_v10 }
  0xe4   : > { %1891 = vmatmul.mubr.msk.bf16.vlgmr.msra.gmra.mrb[4].mxu1 %vm519_vm1, %v535_v23 }
  0xe5   : > { %1902 = vmatprep.mubr.msk.bf16.mxu1 %vm2234_vm2, %v2233_v10 }
 0x1a7   : > { %v653_v28 = vpop.f32.mrb[0].mxu1 }
 0x1a8   : > { %v655_v29 = vpop.f32.mrb[1].mxu1  ;;  %v707_v33 = vmul.f32 %v705_v27, %v653_v28  ;;  %v702_v42 = vmul.f32 %v700_v38, %v653_v28 }
 0x1a9   : > { %v657_v30 = vpop.f32.mrb[2].mxu1  ;;  %v714_v31 = vmul.f32 %v705_v27, %v655_v29  ;;  %v713_v39 = vmul.f32 %v700_v38, %v655_v29 }
 0x1aa   : > { %v658_v32 = vpop.f32.mrb[3].mxu1 }
 0x1ab   : > { %716 = vrot.lane.b32.xlu1 %v714_v31, %s2235_s17 }
 0x1af   : > { %709 = vrot.lane.b32.xlu1 %v707_v33, %s2235_s17 }
 0x1b7   : > { %v2464_v34 = vpop.f32.mrb[4].mxu1 }
 0x1b8   : > { %v1892_v35 = vpop.f32.mrb[5].mxu1  ;;  %v758_v59 = vpack.c.bf16 %v2464_v34, %v2464_v34 }
 0x1b9   : > { %v697_v36 = vpop.f32.mrb[6].mxu1 }
 0x1ba   : > { %v1893_v37 = vpop.f32.mrb[7].mxu1  ;;  %v1001_v63 = vsel %vm999_vm4, %v758_v59, 0 }
 0x21d   : > { %v717_v40 = vpop.permute.xlu1 %716 }
 0x21e   : > { %v719_v41 = vadd.f32 %v717_v40, %v713_v39 }
 0x220   : > { %v744_v43 = vpack.c.bf16 %v719_v41, %v719_v41 }
 0x221   : > { %v710_v44 = vpop.permute.xlu1 %709 }
 0x222   : > { %v712_v45 = vadd.f32 %v710_v44, %v702_v42  ;;  %v767_v46 = vsel %vm762_vm3, %v744_v43, 0 }
 0x223   : > { %1895 = vmatpush3.bf16.xpose.msra.mxu0 %v767_v46 }
 0x224   : > { %727 = vrot.lane.b32.xlu0 %v712_v45, %s2236_s29  ;;  %721 = vrot.lane.b32.xlu1 %v712_v45, %s2237_s14  ;;  %v730_v47 = vpack.c.bf16 %v712_v45, %v712_v45 }
 0x225   : > { %1906 = vmatprep.subr.bf16.mxu0 %v2233_v10 }
 0x228   : > { %735 = vrot.lane.b32.xlu1 %v719_v41, %s2237_s14 }
 0x22a   : > { %1897 = vmatmul.mubr.msk.bf16.vlgmr.msra.gmra.mrb[0].mxu0 %vm762_vm3, %v730_v47 }
 0x22b   : > { %1908 = vmatprep.mubr.msk.bf16.mxu0 %vm2234_vm2, %v2233_v10 }
 0x22c   : > { %738 = vrot.lane.b32.xlu1 %v719_v41, %s2238_s16 }
 0x230   : > { %741 = vrot.lane.b32.xlu1 %v719_v41, %s2236_s29 }
 0x234   : > { %724 = vrot.lane.b32.xlu1 %v712_v45, %s2238_s16 }
 0x296   : > { %v722_v48 = vpop.permute.xlu1 %721  ;;  %v728_v62 = vpop.permute.xlu0 %727 }
 0x297   : > { %v731_v56 = vpack.c.bf16 %v722_v48, %v722_v48  ;;  %v733_v0 = vpack.c.bf16 %v728_v62, %v728_v62 }
 0x29a   : > { %v736_v49 = vpop.permute.xlu1 %735 }
 0x29b   : > { %v745_v50 = vpack.c.bf16 %v736_v49, %v736_v49 }
 0x29d   : > { %v813_v51 = vsel %vm762_vm3, %v745_v50, 0 }
 0x29e   : > { %1901 = vmatpush3.bf16.xpose.msra.mxu1 %v813_v51  ;;  %v739_v52 = vpop.permute.xlu1 %738 }
 0x29f   : > { %v746_v53 = vpack.c.bf16 %v739_v52, %v739_v52  ;;  %1912 = vmatprep.subr.bf16.mxu1 %v2233_v10 }
 0x2a1   : > { %v859_v54 = vsel %vm762_vm3, %v746_v53, 0 }
 0x2a2   : > { %v742_v55 = vpop.permute.xlu1 %741  ;;  %1907 = vmatpush3.bf16.xpose.msra.mxu0 %v859_v54 }
 0x2a3   : > { %v747_v57 = vpack.c.bf16 %v742_v55, %v742_v55  ;;  %1918 = vmatprep.subr.bf16.mxu0 %v2233_v10 }
 0x2a5   : > { %v905_v58 = vsel %vm762_vm3, %v747_v57, 0  ;;  %1903 = vmatmul.mubr.msk.bf16.vlgmr.msra.gmra.mrb[8].mxu1 %vm762_vm3, %v731_v56 }
 0x2a6   : > { %1913 = vmatpush3.bf16.xpose.msra.mxu1 %v905_v58  ;;  %v725_v60 = vpop.permute.xlu1 %724  ;;  %1914 = vmatprep.mubr.msk.bf16.mxu1 %vm2234_vm2, %v2233_v10 }
 0x2a7   : > { %v732_v61 = vpack.c.bf16 %v725_v60, %v725_v60  ;;  %1924 = vmatprep.subr.bf16.mxu1 %v2233_v10 }
 0x2a9   : > { %1909 = vmatmul.mubr.msk.bf16.vlgmr.msra.gmra.mrb[4].mxu0 %vm762_vm3, %v732_v61 }
 0x2aa   : > { %1919 = vmatpush3.bf16.msra.mxu0 %v1001_v63  ;;  %1920 = vmatprep.mubr.msk.bf16.mxu0 %vm2234_vm2, %v2233_v10 }
 0x2ab   : > { %1930 = vmatprep.subr.bf16.mxu0 %v2233_v10 }
 0x2ad   : > { %1915 = vmatmul.mubr.msk.bf16.vlgmr.msra.gmra.mrb[12].mxu1 %vm762_vm3, %v733_v0 }
 0x2ae   : > { %1926 = vmatprep.mubr.msk.bf16.mxu1 %vm2234_vm2, %v2233_v10 }
 0x2fd   : > { %v803_v7 = vpop.f32.mrb[0].mxu0 }
 0x2fe   : > { %v804_v8 = vadd.f32 %v803_v7, %v516_v6  ;;  %v1898_v11 = vpop.f32.mrb[1].mxu0 }
 0x2ff   : > { %v806_v12 = vpop.f32.mrb[2].mxu0 }
 0x300   : > { %v1899_v13 = vpop.f32.mrb[3].mxu0  ;;  %v948_v14 = vsel %vm947_vm6, %v804_v8, -inf }
 0x301   : > { %949 = vmax.xlane.f32.xlu1 %v948_v14 }
 0x378   : > { %v849_v15 = vpop.f32.mrb[8].mxu1 }
 0x379   : > { %v850_v16 = vadd.f32 %v849_v15, %v516_v6  ;;  %v1904_v17 = vpop.f32.mrb[9].mxu1 }
 0x37a   : > { %v852_v18 = vpop.f32.mrb[10].mxu1 }
 0x37b   : > { %v1905_v19 = vpop.f32.mrb[11].mxu1  ;;  %v951_v20 = vsel %vm947_vm6, %v850_v16, -inf }
 0x37c   : > { %952 = vmax.xlane.f32.xlu0 %v951_v20  ;;  %v895_v21 = vpop.f32.mrb[4].mxu0 }
 0x37d   : > { %v896_v22 = vadd.f32 %v895_v21, %v516_v6  ;;  %v1910_v23 = vpop.f32.mrb[5].mxu0  ;;  %v2074_v21 = vld [vmem:[%s2405_s28] sm:$0xff]  }
 0x37e   : > { %v898_v24 = vpop.f32.mrb[6].mxu0  ;;  %v2076_v23 = vld [vmem:[%s2405_s28 + $0x10] sm:$0xff]  }
 0x37f   : > { %v1911_v25 = vpop.f32.mrb[7].mxu0  ;;  %v954_v26 = vsel %vm947_vm6, %v896_v22, -inf }
 0x380   : > { %v941_v27 = vpop.f32.mrb[12].mxu1  ;;  %955 = vmax.xlane.f32.xlu0 %v954_v26 }
 0x381   : > { %v942_v28 = vadd.f32 %v941_v27, %v516_v6  ;;  %v1916_v29 = vpop.f32.mrb[13].mxu1 }
 0x382   : > { %v944_v30 = vpop.f32.mrb[14].mxu1 }
 0x383   : > { %v1917_v31 = vpop.f32.mrb[15].mxu1  ;;  %v957_v32 = vsel %vm947_vm6, %v942_v28, -inf }
 0x384   : > { %958 = vmax.xlane.f32.xlu1 %v957_v32  ;;  %v2077_v31 = vld [vmem:[%s2405_s28 + $0x18] sm:$0xff]  }
 0x38e   : > { %v950_v33 = vpop.xlane.xlu1 %949 }
 0x38f   : > { %v960_v35 = vsub.f32 %v804_v8, %v950_v33 }
 0x391   : > { %v964_v36 = vmul.f32 1.442695, %v960_v35 }
 0x393   : > { %2100 = vpow2.f32 %v964_v36 }
 0x39d   : > { %v2101_v37 = vpop.eup %2100 }
 0x39e   : > { %v972_v38 = vsel %vm947_vm6, %v2101_v37, 0.0 }
 0x39f   : > { %973 = vadd.xlane.f32.xlu0 %v972_v38 }
 0x409   : > { %v953_v39 = vpop.xlane.xlu0 %952 }
 0x40a   : > { %v961_v40 = vsub.f32 %v850_v16, %v953_v39 }
 0x40c   : > { %v966_v41 = vmul.f32 1.442695, %v961_v40 }
 0x40d   : > { %v956_v42 = vpop.xlane.xlu0 %955 }
 0x40e   : > { %2102 = vpow2.f32 %v966_v41  ;;  %v962_v43 = vsub.f32 %v896_v22, %v956_v42  ;;  %v2075_v22 = vld [vmem:[%s2405_s28 + $0x8] sm:$0xff]  }
 0x410   : > { %v968_v44 = vmul.f32 1.442695, %v962_v43 }
 0x411   : > { %v959_v50 = vpop.xlane.xlu1 %958 }
 0x412   : > { %2104 = vpow2.f32 %v968_v44  ;;  %v963_v53 = vsub.f32 %v942_v28, %v959_v50 }
 0x414   : > { %v970_v55 = vmul.f32 1.442695, %v963_v53  ;;  %v2083_v53 = vld [vmem:[%s2410_s23 + $0x14] ss:$8 sps:$4 sm:$0xff]  }
 0x418   : > { %v2103_v45 = vpop.eup %2102 }
 0x419   : > { %v975_v46 = vsel %vm947_vm6, %v2103_v45, 0.0 }
 0x41a   : > { %976 = vadd.xlane.f32.xlu1 %v975_v46 }
 0x41c   : > { %v2105_v47 = vpop.eup %2104 }
 0x41d   : > { %v978_v48 = vsel %vm947_vm6, %v2105_v47, 0.0 }
 0x41e   : > { %979 = vadd.xlane.f32.xlu0 %v978_v48 }
 0x42b   : > { %752 = vrot.lane.b32.xlu1 %v2464_v34, %s2238_s16 }
 0x42c   : > { %v974_v49 = vpop.xlane.xlu0 %973 }
 0x42d   : > { %2106 = vrcp.f32 %v974_v49 }
 0x42e   : > { %2108 = vpow2.f32 %v970_v55  ;;  %v2084_v55 = vld [vmem:[%s2410_s23 + $0x20] ss:$8 sps:$4 sm:$0xff]  }
 0x434   : > { %749 = vrot.lane.b32.xlu0 %v2464_v34, %s2237_s14 }
 0x437   : > { %v2107_v51 = vpop.eup %2106 }
 0x438   : > { %v988_v52 = vmul.f32 %v2107_v51, %v2101_v37  ;;  %v2109_v56 = vpop.eup %2108  ;;  %v2080_v51 = vld [vmem:[%s2410_s23 + $0x4] ss:$8 sps:$4 sm:$0xff]  }
 0x439   : > { %v981_v57 = vsel %vm947_vm6, %v2109_v56, 0.0 }
 0x43a   : > { %v992_v54 = vpack.c.bf16 %v988_v52, %v988_v52  ;;  %v2078_v52 = vld [vmem:[%s2410_s23] ss:$8 sps:$4 sm:$0xff]  }
 0x43c   : > { %1921 = vmatmul.mubr.msk.bf16.vlgmr.msra.gmra.mrb[8].mxu0 %vm947_vm6, %v992_v54  ;;  %v2081_v54 = vld [vmem:[%s2410_s23 + $0x10] ss:$8 sps:$4 sm:$0xff]  }
 0x43d   : > { %1932 = vmatprep.mubr.msk.bf16.mxu0 %vm2234_vm2, %v2233_v10 }
 0x44f   : > { %982 = vadd.xlane.f32.xlu1 %v981_v57  ;;  %v2089_v57 = vld [vmem:[%s2410_s23 + $0x34] ss:$8 sps:$4 sm:$0xff]  }
 0x460   : > { %755 = vrot.lane.b32.xlu1 %v2464_v34, %s2236_s29 }
 0x4a7   : > { %v977_v58 = vpop.xlane.xlu1 %976 }
 0x4a8   : > { %2110 = vrcp.f32 %v977_v58 }
 0x4ab   : > { %v753_v59 = vpop.permute.xlu1 %752  ;;  %v980_v60 = vpop.xlane.xlu0 %979 }
 0x4ac   : > { %v760_v61 = vpack.c.bf16 %v753_v59, %v753_v59  ;;  %2112 = vrcp.f32 %v980_v60 }
 0x4ae   : > { %v1093_v62 = vsel %vm999_vm4, %v760_v61, 0 }
 0x4af   : > { %1931 = vmatpush3.bf16.msra.mxu0 %v1093_v62  ;;  %v750_v63 = vpop.permute.xlu0 %749  ;;  %v1808_v62 = vld [vmem:[%s2707_s15] ss:$0 sm:$0xff] }
 0x4b0   : > { %v759_v0 = vpack.c.bf16 %v750_v63, %v750_v63  ;;  %1942 = vmatprep.subr.bf16.mxu0 %v2233_v10 }
 0x4b2   : > { %v2111_v2 = vpop.eup %2110  ;;  %v1047_v3 = vsel %vm999_vm4, %v759_v0, 0 }
 0x4b3   : > { %v989_v4 = vmul.f32 %v2111_v2, %v2103_v45  ;;  %1925 = vmatpush3.bf16.msra.mxu1 %v1047_v3  ;;  %v2090_v3 = vld [vmem:[%s2415_s13] sm:$0xff]  }
 0x4b4   : > { %1936 = vmatprep.subr.bf16.mxu1 %v2233_v10 }
 0x4b5   : > { %v993_v34 = vpack.c.bf16 %v989_v4, %v989_v4  ;;  %v2091_v4 = vld [vmem:[%s2415_s13 + $0x8] sm:$0xff]  }
 0x4b6   : > { %v2113_v5 = vpop.eup %2112 }
 0x4b7   : > { %v990_v6 = vmul.f32 %v2113_v5, %v2105_v47  ;;  %1927 = vmatmul.mubr.msk.bf16.vlgmr.msra.gmra.mrb[16].mxu1 %vm947_vm6, %v993_v34  ;;  %v2092_v34 = vld [vmem:[%s2415_s13 + $0x10] sm:$0xff]   ;;  %v2093_v5 = vld [vmem:[%s2415_s13 + $0x18] sm:$0xff]  }
 0x4b8   : > { %1938 = vmatprep.mubr.msk.bf16.mxu1 %vm2234_vm2, %v2233_v10 }
 0x4b9   : > { %v994_v7 = vpack.c.bf16 %v990_v6, %v990_v6  ;;  %v2094_v6 = vld [vmem:[%s2415_s13 + $0x20] sm:$0xff]  }
 0x4bb   : > { %1933 = vmatmul.mubr.msk.bf16.vlgmr.msra.gmra.mrb[12].mxu0 %vm947_vm6, %v994_v7  ;;  %v2095_v7 = vld [vmem:[%s2415_s13 + $0x28] sm:$0xff]  }
 0x4bc   : > { %1950 = vmatprep.mubr.msk.bf16.mxu0 %vm2234_vm2, %v2233_v10  ;;  %1943 = vmatpush3.bf16.msra.mxu0 %v2074_v21 }
 0x4bd   : > { %1944 = vmatprep.subr.bf16.mxu0 %v2233_v10 }
 0x4c0   : > { %1945 = vmatpush3.bf16.msra.mxu0 %v2075_v22 }
 0x4c1   : > { %1946 = vmatprep.subr.bf16.mxu0 %v2233_v10 }
 0x4c4   : > { %1947 = vmatpush3.bf16.msra.mxu0 %v2076_v23 }
 0x4c5   : > { %1948 = vmatprep.subr.bf16.mxu0 %v2233_v10 }
 0x4c8   : > { %1949 = vmatpush3.bf16.msra.mxu0 %v2077_v31  ;;  %v2127_v31 = vld [vmem:[%s2675_s10 + $0x10] ss:$8 sps:$4 sm:$0xff] (!%p1827_p1)  }
 0x4c9   : > { %1954 = vmatprep.subr.bf16.mxu0 %v2233_v10 }
 0x4dc   : > { %v983_v8 = vpop.xlane.xlu1 %982 }
 0x4dd   : > { %2114 = vrcp.f32 %v983_v8  ;;  %v2096_v8 = vld [vmem:[%s2415_s13 + $0x30] sm:$0xff]  }
 0x4e0   : > { %v756_v11 = vpop.permute.xlu1 %755 }
 0x4e1   : > { %v761_v12 = vpack.c.bf16 %v756_v11, %v756_v11  ;;  %v2097_v11 = vld [vmem:[%s2415_s13 + $0x38] sm:$0xff]  }
 0x4e3   : > { %v1139_v13 = vsel %vm999_vm4, %v761_v12, 0 }
 0x4e4   : > { %1937 = vmatpush3.bf16.msra.mxu1 %v1139_v13 }
 0x4e5   : > { %1343 = vmatprep.subr.bf16.mxu1 %v2080_v51 }
 0x4e7   : > { %v2115_v14 = vpop.eup %2114 }
 0x4e8   : > { %v991_v15 = vmul.f32 %v2115_v14, %v2109_v56  ;;  %v2087_v56 = vld [vmem:[%s2410_s23 + $0x30] ss:$8 sps:$4 sm:$0xff]  }
 0x4ea   : > { %v995_v16 = vpack.c.bf16 %v991_v15, %v991_v15 }
 0x4ec   : > { %1939 = vmatmul.mubr.msk.bf16.vlgmr.msra.gmra.mrb[20].mxu1 %vm947_vm6, %v995_v16 }
 0x4ed   : > { %1375 = vmatprep.mubr.bf16.mxu1 %v2232_v9  ;;  %1344 = vmatpush1.bf16.msra.mxu1 %v2078_v52 }
 0x4ee   : > { %1345 = vmatprep.subr.bf16.mxu1 %v2083_v53 }
 0x4f1   : > { %1346 = vmatpush1.bf16.msra.mxu1 %v2081_v54 }
 0x50f   : > { %v1037_v17 = vpop.f32.mrb[8].mxu0 }
 0x510   : > { %v1922_v18 = vpop.f32.mrb[9].mxu0 }
 0x511   : > { %v1040_v19 = vpop.f32.mrb[10].mxu0 }
 0x512   : > { %v1923_v20 = vpop.f32.mrb[11].mxu0 }
 0x58a   : > { %v1083_v24 = vpop.f32.mrb[16].mxu1 }
 0x58b   : > { %1182 = vrot.lane.b32.xlu0 %v1083_v24, %s2240_s25  ;;  %v1928_v25 = vpop.f32.mrb[17].mxu1 }
 0x58c   : > { %v1086_v26 = vpop.f32.mrb[18].mxu1 }
 0x58d   : > { %v1929_v9 = vpop.f32.mrb[19].mxu1 }
 0x58e   : > { %v1129_v27 = vpop.f32.mrb[12].mxu0 }
 0x58f   : > { %1186 = vrot.lane.b32.xlu1 %v1129_v27, %s2241_s12  ;;  %v1934_v28 = vpop.f32.mrb[13].mxu0 }
 0x590   : > { %v1132_v29 = vpop.f32.mrb[14].mxu0  ;;  %v2122_v28 = vld [vmem:[%s2675_s10 + $0x4] ss:$8 sps:$4 sm:$0xff] (!%p1827_p1)  }
 0x591   : > { %v1935_v30 = vpop.f32.mrb[15].mxu0  ;;  %v2124_v29 = vld [vmem:[%s2675_s10] ss:$8 sps:$4 sm:$0xff] (!%p1827_p1)  }
 0x592   : > { %v2125_v30 = vld [vmem:[%s2675_s10 + $0x14] ss:$8 sps:$4 sm:$0xff] (!%p1827_p1)  }
 0x5bf   : > { %v1175_v32 = vpop.f32.mrb[20].mxu1 }
 0x5c0   : > { %1190 = vrot.lane.b32.xlu0 %v1175_v32, %s2242_s22  ;;  %v1940_v33 = vpop.f32.mrb[21].mxu1  ;;  %v2128_v32 = vld [vmem:[%s2675_s10 + $0x24] ss:$8 sps:$4 sm:$0xff] (!%p1827_p1)  }
 0x5c1   : > { %v1178_v35 = vpop.f32.mrb[22].mxu1  ;;  %v2130_v33 = vld [vmem:[%s2675_s10 + $0x20] ss:$8 sps:$4 sm:$0xff] (!%p1827_p1)  }
 0x5c2   : > { %v1941_v36 = vpop.f32.mrb[23].mxu1  ;;  %v2131_v35 = vld [vmem:[%s2675_s10 + $0x34] ss:$8 sps:$4 sm:$0xff] (!%p1827_p1)  }
 0x5c3   : > { %v2133_v36 = vld [vmem:[%s2675_s10 + $0x30] ss:$8 sps:$4 sm:$0xff] (!%p1827_p1)  }
 0x5fd   : > { %v1183_v37 = vpop.permute.xlu0 %1182 }
 0x5fe   : > { %v1193_v39 = vsel %vm762_vm3, %v1037_v17, %v1183_v37  ;;  %v2243_v37 = vmov (!%p1827_p1), 0  }
 0x601   : > { %v1187_v38 = vpop.permute.xlu1 %1186 }
 0x602   : > { %v1195_v40 = vsel %vm1194_vm7, %v1193_v39, %v1187_v38 }
 0x632   : > { %v1191_v41 = vpop.permute.xlu0 %1190 }
 0x633   : > { %v1197_v42 = vsel %vm1196_vm8, %v1195_v40, %v1191_v41 }
 0x634   : > { %v1198_v43 = vpack.c.bf16 %v1197_v42, %v1197_v42  ;;  %v1828_v42 = vld [vmem:[%s2708_s19] ss:$0 sm:$0xff] (!%p1827_p1) }
 0x636   : > { %1951 = vmatmul.mubr.msk.bf16.vlgmr.msra.gmra.mrb[16].mxu0 %vm519_vm1, %v1198_v43 }
 0x637   : > { %1970 = vmatprep.mubr.msk.bf16.mxu0 %vm2234_vm2, %v2233_v10  ;;  %1955 = vmatpush3.bf16.msra.mxu0 %v2090_v3 }
 0x638   : > { %1956 = vmatprep.subr.bf16.mxu0 %v2233_v10 }
 0x63b   : > { %1957 = vmatpush3.bf16.msra.mxu0 %v2091_v4 }
 0x63c   : > { %1958 = vmatprep.subr.bf16.mxu0 %v2233_v10 }
 0x63f   : > { %1959 = vmatpush3.bf16.msra.mxu0 %v2092_v34 }
 0x640   : > { %1960 = vmatprep.subr.bf16.mxu0 %v2233_v10 }
 0x643   : > { %1961 = vmatpush3.bf16.msra.mxu0 %v2093_v5 }
 0x644   : > { %1962 = vmatprep.subr.bf16.mxu0 %v2233_v10 }
 0x647   : > { %1963 = vmatpush3.bf16.msra.mxu0 %v2094_v6 }
 0x648   : > { %1964 = vmatprep.subr.bf16.mxu0 %v2233_v10 }
 0x64b   : > { %1965 = vmatpush3.bf16.msra.mxu0 %v2095_v7 }
 0x64c   : > { %1966 = vmatprep.subr.bf16.mxu0 %v2233_v10 }
 0x64f   : > { %1967 = vmatpush3.bf16.msra.mxu0 %v2096_v8 }
 0x650   : > { %1968 = vmatprep.subr.bf16.mxu0 %v2233_v10 }
 0x653   : > { %1969 = vmatpush3.bf16.msra.mxu0 %v2097_v11 }
 0x654   : > { %1571 = vmatprep.subr.bf16.mxu0 (!%p1827_p1), %v2122_v28 }
 0x709   : > { %v1268_v44 = vpop.f32.mrb[16].mxu0 }
 0x70a   : > { %v2542_v45 = vadd.f32 %v1268_v44, %v2420_v1  ;;  %v1952_v46 = vpop.f32.mrb[17].mxu0  ;;  %v2086_v1 = vld [vmem:[%s2410_s23 + $0x24] ss:$8 sps:$4 sm:$0xff]  }
 0x70b   : > { %v1271_v47 = vpop.f32.mrb[18].mxu0  ;;  %1347 = vmatprep.subr.bf16.mxu1 %v2086_v1 }
 0x70c   : > { %v1953_v48 = vpop.f32.mrb[19].mxu0  ;;  %v1276_v49 = vmul.f32 %v2542_v45, %v2542_v45  ;;  %1348 = vmatpush1.bf16.msra.mxu1 %v2084_v55 }
 0x70d   : > { %1349 = vmatprep.subr.bf16.mxu1 %v2089_v57 }
 0x70e   : > { %v1277_v50 = vsel %vm519_vm1, %v1276_v49, 0.0 }
 0x70f   : > { %1278 = vadd.xlane.f32.xlu1 %v1277_v50 }
 0x710   : > { %1350 = vmatpush1.bf16.msra.mxu1 %v2087_v56 }
 0x79c   : > { %v1279_v58 = vpop.xlane.xlu1 %1278 }
 0x79d   : > { %v1280_v59 = vmul.f32 0.015625, %v1279_v58 }
 0x79f   : > { %v1281_v60 = vadd.f32 1e-05, %v1280_v59 }
 0x7a1   : > { %2116 = vrsqrt.f32 %v1281_v60 }
 0x7ab   : > { %v2117_v61 = vpop.eup %2116 }
 0x7ac   : > { %v1283_v63 = vmul.f32 %v2117_v61, %v2542_v45 }
 0x7ae   : > { %v1290_v0 = vmul.f32 %v1808_v62, %v1283_v63 }
 0x7b0   : > { %v1291_v2 = vpack.c.bf16 %v1290_v0, %v1290_v0 }
 0x7b2   : > { %1817 = vmatmul.mubr.msk.bf16.vlgmr.msra.gmra.mrb[24].mxu1 %vm519_vm1, %v1291_v2 }
 0x885   : > { %v1377_v12 = vpop.f32.mrb[24].mxu1 }
 0x886   : > { %v1818_v13 = vmul.f32 -1.442695, %v1377_v12  ;;  %v1379_v14 = vpop.f32.mrb[25].mxu1 }
 0x887   : > { %v1381_v15 = vpop.f32.mrb[26].mxu1 }
 0x888   : > { %2118 = vpow2.f32 %v1818_v13  ;;  %v1382_v16 = vpop.f32.mrb[27].mxu1 }
 0x892   : > { %v2119_v17 = vpop.eup %2118 }
 0x893   : > { %v1387_v18 = vadd.f32 1.0, %v2119_v17 }
 0x895   : > { %2120 = vrcp.f32 %v1387_v18 }
 0x89f   : > { %v2121_v19 = vpop.eup %2120 }
 0x8a0   : > { %v1390_v20 = vmul.f32 %v2121_v19, %v1377_v12 }
 0x8a2   : > { %v1391_v21 = vmul.f32 %v1390_v20, %v1379_v14 }
 0x8a4   : > { %v1392_v22 = vpack.c.bf16 %v1391_v21, %v1391_v21 }
 0x8a6   : > { %1971 = vmatmul.mubr.bf16.vlgmr.msra.gmra.mrb[20].mxu0 %v1392_v22 }
 0x8a7   : > { %1572 = vmatpush1.bf16.msra.mxu0 (!%p1827_p1), %v2124_v29  ;;  %1603 = vmatprep.mubr.bf16.mxu0 (!%p1827_p1), %v2243_v37 }
 0x8a8   : > { %1573 = vmatprep.subr.bf16.mxu0 (!%p1827_p1), %v2125_v30 }
 0x8ab   : > { %1574 = vmatpush1.bf16.msra.mxu0 (!%p1827_p1), %v2127_v31 }
 0x8ac   : > { %1575 = vmatprep.subr.bf16.mxu0 (!%p1827_p1), %v2128_v32 }
 0x8af   : > { %1576 = vmatpush1.bf16.msra.mxu0 (!%p1827_p1), %v2130_v33 }
 0x8b0   : > { %1577 = vmatprep.subr.bf16.mxu0 (!%p1827_p1), %v2131_v35 }
 0x8b3   : > { %1578 = vmatpush1.bf16.msra.mxu0 (!%p1827_p1), %v2133_v36 }
 0x976   : > { %1502 = sbr.rel (%p1827_p1) target bundleno = 2809 (0xaf9), region = 72 }
 0x979   : > { %v1491_v23 = vpop.f32.mrb[20].mxu0 }
 0x97a   : > { %v1497_v24 = vadd.f32 %v1491_v23, %v2542_v45  ;;  %v1972_v10 = vpop.f32.mrb[21].mxu0 }
 0x97b   : > { %v1494_v25 = vpop.f32.mrb[22].mxu0 }
 0x97c   : > { %1498 = vst.msk [vmem:[#allocation2] sm:$0xff] %vm519_vm1, %v1497_v24  ;;  %v1973_v26 = vpop.f32.mrb[23].mxu0  ;;  %v1504_v9 = vmul.f32 (!%p1827_p1), %v1497_v24, %v1497_v24 }
 0x97e   : > { %v1505_v27 = vsel %vm519_vm1, %v1504_v9, 0.0 }
 0x97f   : > { %1506 = vadd.xlane.f32.xlu0 %v1505_v27 }
 0xa0c   : > { %v1507_v38 = vpop.xlane.xlu0 %1506 }
 0xa0d   : > { %v1508_v39 = vmul.f32 0.015625, %v1507_v38 }
 0xa0f   : > { %v1509_v40 = vadd.f32 1e-05, %v1508_v39 }
 0xa11   : > { %2134 = vrsqrt.f32 %v1509_v40 }
 0xa1b   : > { %v2135_v41 = vpop.eup %2134 }
 0xa1c   : > { %v1511_v43 = vmul.f32 %v2135_v41, %v1497_v24 }
 0xa1e   : > { %v1518_v44 = vmul.f32 %v1828_v42, %v1511_v43 }
 0xa20   : > { %v1519_v45 = vpack.c.bf16 %v1518_v44, %v1518_v44 }
 0xa22   : > { %1837 = vmatmul.mubr.msk.bf16.vlgmr.msra.gmra.mrb[0].mxu0 %vm519_vm1, %v1519_v45 }
 0xaf5   : > { %v1605_v46 = vpop.f32.mrb[0].mxu0 }
 0xaf6   : > { %1612 = vst [vmem:[%s2417_s30] sm:$0xff] %v1605_v46  ;;  %v1607_v47 = vpop.f32.mrb[1].mxu0 }
 0xaf7   : > { %1613 = vst [vmem:[%s2417_s30 + $0x8] sm:$0xff] %v1607_v47  ;;  %v1609_v48 = vpop.f32.mrb[2].mxu0 }
 0xaf8   : > { %v1610_v49 = vpop.f32.mrb[3].mxu0 }
 0xaf9 PF: > { %s2709_s15 = sld [smem:[#allocation9_spill]]  ;;  %s2712_s17 = sld [smem:[#allocation19_spill]] }
 0xafa   : > { %s2710_s26 = sld [smem:[#allocation7_spill]]  ;;  %s1629_s18 = sshll.u32 %s2417_s30, 4  ;;  %s1630_s18 = int_to_ptr.vmem [resolvable:$true] %s1629_s18 }
 0xafb   : > { %s2136_s29 = scalar_lea.vmem %s1630_s18, 256  ;;  %s2244_s14 = smov [#allocation3]  }
 0xafc   : > { %p2137_p2 = scmp.ne.s32.totalorder %s1630_s18, %s2136_s29  ;;  %s2140_s16 = sshll.u32 %s2244_s14, 4  ;;  %s2141_s16 = int_to_ptr.vmem [resolvable:$false] %s2140_s16 }
 0xafd   : > { %s2142_s25 = scalar_lea.vmem %s2141_s16, 512  ;;  %p2143_p6 = scmp.lt.s32.totalorder %s1630_s18, %s2141_s16 }
 0xafe   : > { %p2138_p4 = pnand %p2137_p2, %p2354_p3  ;;  %p2144_p7 = scmp.lt.s32.totalorder %s2142_s25, %s2136_s29 }
 0xaff   : > { %s1846_s13 = sshll.u32 %s2709_s15, 8  ;;  %s2713_s27 = smov %s2712_s17 }
 0xb00   : > { %s2615_s20 = scalar_lea.hbm %s2712_s17, %s1846_s13  ;;  %s2714_s24 = sand.u32 1, %s2710_s26  }
 0xb01   : > { %s1615_s21 = scalar_lea.sflag [#allocation4], %s2714_s24  ;;  %p2139_p5 = pneg %p2138_p4 }
 0xb02   : > { %p2145_p8 = por %p2144_p7, %p2143_p6 }
 0xb04   : > { %p2146_p10 = pnand %p2145_p8, %p2139_p5 }
 0xb06   : > { %2149 = shalt.err (!%p2146_p10)
}
 0xb07   : > { %s2150_s30 = scalar_lea.hbm %s2615_s20, 256  ;;  %s2154_s28 = scalar_lea.hbm %s2713_s27, 512 }
 0xb08   : > { %p2151_p11 = scmp.ne.s32.totalorder %s2615_s20, %s2150_s30  ;;  %p2155_p0 = scmp.lt.u32.totalorder %s2615_s20, %s2713_s27 }
 0xb09   : > { %p2156_p1 = scmp.lt.u32.totalorder %s2154_s28, %s2150_s30  ;;  %p2158_p4 = scmp.lt.u32.totalorder %s2150_s30, %s2615_s20 }
 0xb0a   : > { %p2152_p12 = pnand %p2151_p11, %p2354_p3 }
 0xb0b   : > { %p2157_p2 = por %p2156_p1, %p2155_p0 }
 0xb0c   : > { %p2153_p13 = pneg %p2152_p12 }
 0xb0d   : > { %p2159_p5 = por %p2158_p4, %p2157_p2 }
 0xb0f   : > { %p2160_p6 = pnand %p2159_p5, %p2153_p13 }
 0xb11   : > { %2163 = shalt.err (!%p2160_p6)
}
 0xb12   : > { %1975 = dma.vmem_to_hbm [thread:$0]  (%p2354_p3), %s1630_s18, 256, %s2615_s20, %s1615_s21  }
 0xb13 PF: > { %s2715_s26 = sld [smem:[#allocation12_spill]]  ;;  %s2716_s13 = sld [smem:[#allocation6_spill]] }
 0xb19   : > { %p1981_p7 = scmp.ge.s32.totalorder %s2715_s26, 2  ;;  %s1641_s11 = sand.u32 1, %s2716_s13  }
 0xb1a   : > { %s1642_s17 = scalar_lea.sflag [#allocation4], %s1641_s11 }
 0xb1b   : > { %p1978_p8 = pnand %p1981_p7, %p2364_p9 }
 0xb1d   : > { %2197 = dma.done.wait (!%p1978_p8), %s1642_s17, 256  }
 0xb1e   : > { %2199 = vsyncadd (!%p1978_p8), %s1642_s17, 4294967040  ;;  %s24_s24 = sadd.s32 1, %s2715_s26   ;;  %s2718_s17 = sld [smem:[#allocation7_spill]] }
 0xb1f   : > { %p21_p10 = scmp.ge.s32.totalorder %s24_s24, 6   ;;  %s2719_s18 = sld [smem:[#allocation8_spill]] }
 0xb20   : > { %s2720_s19 = sld [smem:[#allocation17_spill]]  ;;  %s2721_s20 = sld [smem:[#allocation10_spill]] }
 0xb21   : > { %s2722_s21 = sld [smem:[#allocation11_spill]]  ;;  %s2723_s22 = sld [smem:[#allocation13_spill]] }
 0xb22   : > { %s2724_s23 = sld [smem:[#allocation15_spill]]  ;;  %23 = sbr.rel (!%p21_p10) target bundleno = 8 (0x8), region = 125 }
 0xb29   :  { %1647 = vsyncpa [#allocation4], 1 }
 0xb2a   :  { %1649 = vsyncpa [#allocation4 + $0x1], 1 }

</bundles_post_ra>
